<compile_context>
chip_gen: v6e
topology: v6e:2x2x1
jax: 0.10.0
libtpu: 0.0.40
codegen_flags: <defaults>
</compile_context>

<pallas_src>
import numpy as np
import jax
import jax.numpy as jnp
from jax import lax
from jax.experimental import pallas as pl
from jax.experimental.pallas import tpu as pltpu


def _mle_dis_kernel(triu_ref, lens_ref, m_ref, v_ref, out_ref):
    """One grid step == one lane-batch of B query groups.

    Layout: documents along sublanes (axis 0, padded to G), groups along lanes
    (axis 1, B per block).  For a group sorted by descending targets:
        S[j]   = sum_{i >= j} exp( m_i - m_j + (v_i + v_j)/2 )
        loss_g = mean_j( -log(1 / S[j]) ) = mean_j log S[j]
    Factored as exp(a_i) * exp(b_j) with a_i = m_i + v_i/2, b_j = -m_j + v_j/2,
    the suffix sum over i >= j is a (G, G) triu-mask matmul on the MXU.
    """
    m = m_ref[...]                                     # (G, B) sorted means
    v = v_ref[...]                                     # (G, B) sorted variances
    n = lens_ref[...]                                  # (1, B) int32 group sizes

    doc = lax.broadcasted_iota(jnp.int32, m.shape, 0)  # in-group position i
    valid = doc < n                                    # (G, B)

    a = m + 0.5 * v                                    # a_i = m_i + v_i/2
    b = -m + 0.5 * v                                   # b_j = -m_j + v_j/2

    # Per-group max shift (exact math, avoids f32 exp overflow).
    neg_big = jnp.float32(-1e30)
    a_max = jnp.max(jnp.where(valid, a, neg_big), axis=0, keepdims=True)   # (1, B)
    exp_a = jnp.exp(jnp.where(valid, a - a_max, neg_big))                  # 0 at padding

    # suffix[j, g] = sum_{i >= j} exp(a_i - a_max);  triu[j, i] = (i >= j)
    suffix = jnp.dot(triu_ref[...], exp_a, preferred_element_type=jnp.float32)

    safe = jnp.where(valid, suffix, 1.0)
    log_s = jnp.where(valid, b + a_max + jnp.log(safe), 0.0)               # (G, B)

    inv_n = pl.reciprocal(jnp.maximum(n.astype(jnp.float32), 1.0), approx=True)
    out_ref[...] = jnp.sum(log_s, axis=0, keepdims=True) * inv_n           # (1, B)


def mle_dis_loss(mean, variance, scope, targets, *, group_pad=128, lane_block=128):
    """Pallas-backed equivalent of MLEDisLoss.forward(mean, variance, scope, targets, gpu).

    The `gpu` device-placement argument of the PyTorch module has no meaning here.
    group_pad:  padded per-group document count (MXU contraction dim); use 256 on
                v6e/v7x if real group sizes can exceed 128.
    lane_block: groups processed per grid step (MXU N dim / output lane width);
                128 works everywhere, 256 fills the v6e/v7x MXU.
    """
    scope = [int(s) for s in scope]
    num_groups = len(scope)
    assert num_groups > 0 and all(s > 0 for s in scope), "every group must be non-empty"
    G = int(group_pad)
    assert max(scope) <= G, "group_pad must be >= the largest group"
    N = sum(scope)
    assert mean.shape[0] == N and variance.shape[0] == N and targets.shape[0] == N

    # ---- vectorised data prep (no per-group Python loop of JAX ops) -------------
    offs = np.concatenate([[0], np.cumsum(scope)]).astype(np.int64)
    pos = np.arange(G)[None, :]                                    # (1, G)
    valid_np = pos < np.asarray(scope)[:, None]                    # (num_groups, G)
    gather_idx = jnp.asarray(
        np.where(valid_np, offs[:-1, None] + pos, N).astype(np.int32))   # sentinel = N

    m_flat = jnp.concatenate([mean[:, 0].astype(jnp.float32), jnp.zeros((1,), jnp.float32)])
    v_flat = jnp.concatenate([variance[:, 0].astype(jnp.float32), jnp.zeros((1,), jnp.float32)])
    t_flat = jnp.concatenate([targets.astype(jnp.float32),
                              jnp.full((1,), -jnp.inf, jnp.float32)])

    m_g = m_flat[gather_idx]                                       # (num_groups, G)
    v_g = v_flat[gather_idx]
    t_g = t_flat[gather_idx]                                       # padding -> -inf

    order = jnp.argsort(-t_g, axis=1)                              # batched descending sort
    m_s = jnp.take_along_axis(m_g, order, axis=1)
    v_s = jnp.take_along_axis(v_g, order, axis=1)

    # Groups along lanes, documents along sublanes; pad group count to a lane block.
    B = int(lane_block)
    ng_pad = ((num_groups + B - 1) // B) * B
    pad_cols = ng_pad - num_groups
    m_t = jnp.pad(m_s.T, ((0, 0), (0, pad_cols)))                  # (G, ng_pad)
    v_t = jnp.pad(v_s.T, ((0, 0), (0, pad_cols)))
    lens = jnp.asarray(
        np.pad(np.asarray(scope, np.int32), (0, pad_cols)).reshape(1, ng_pad))
    triu = jnp.asarray(np.triu(np.ones((G, G), np.float32)))       # suffix-sum mask

    num_blocks = ng_pad // B
    per_group = pl.pallas_call(
        _mle_dis_kernel,
        out_shape=jax.ShapeDtypeStruct((1, ng_pad), jnp.float32),
        grid=(num_blocks,),
        in_specs=[
            pl.BlockSpec((G, G), lambda blk: (0, 0)),     # triu mask: resident across grid
            pl.BlockSpec((1, B), lambda blk: (0, blk)),   # group sizes (lane vector)
            pl.BlockSpec((G, B), lambda blk: (0, blk)),   # sorted means
            pl.BlockSpec((G, B), lambda blk: (0, blk)),   # sorted variances
        ],
        out_specs=pl.BlockSpec((1, B), lambda blk: (0, blk)),      # lane-dense per-group loss
        compiler_params=pltpu.CompilerParams(
            dimension_semantics=("parallel",),            # no cross-step carry anymore
        ),
    )(triu, lens, m_t, v_t)

    # Final reduction (losses / len(scope)) in full precision, outside the kernel.
    loss = jnp.sum(per_group[0, :num_groups]) / jnp.float32(num_groups)
    return loss.reshape(1)                                         # matches torch shape (1,)


def _reference_loss(mean, variance, scope, targets):
    """Literal NumPy transcription of the PyTorch forward for verification."""
    mean = np.asarray(mean, np.float64)
    variance = np.asarray(variance, np.float64)
    targets = np.asarray(targets, np.float64)
    score = np.concatenate([mean, variance], axis=1)
    losses, off = 0.0, 0
    for n in scope:
        item, t = score[off:off + n], targets[off:off + n]
        off += n
        si = item[np.argsort(-t)]
        m, v = si[:, 0], si[:, 1]
        x1 = -np.tile(m, (n, 1))          # x1[i, j] = -m[j]
        x2 = -x1.T                        # x2[i, j] =  m[i]
        y1 = np.tile(v, (n, 1))           # y1[i, j] =  v[j]
        y2 = y1.T                         # y2[i, j] =  v[i]
        e = np.exp(x1 + x2 + (y1 + y2) / 2.0)
        s = np.sum(np.tril(e), axis=0)
        losses += np.mean(-np.log(1.0 / s))
    return np.array([losses / len(scope)], np.float32)


if __name__ == "__main__":
    key = jax.random.PRNGKey(0)
    k_m, k_v, k_t = jax.random.split(key, 3)

    N = 16
    scope = [6, 5, 5]                                  # variable group sizes, sum == N
    mean = jax.random.normal(k_m, (N, 1), dtype=jnp.float32)
    variance = jax.random.normal(k_v, (N, 1), dtype=jnp.float32)
    targets = jax.random.normal(k_t, (N,), dtype=jnp.float32)

    out = mle_dis_loss(mean, variance, scope, targets)
    out = jax.block_until_ready(out)

    ref = _reference_loss(np.asarray(mean), np.asarray(variance), scope, np.asarray(targets))
    # rtol accounts for the approximate (EUP) reciprocal used for 1/n in-kernel.
    np.testing.assert_allclose(np.asarray(out), ref, rtol=1e-3, atol=1e-5)

    print("KERNEL_OK")
</pallas_src>

<mosaic_0001>
module attributes {stable_mosaic.version = 11 : i64} {
  func.func @_mle_dis_kernel(%arg0: i32, %arg1: memref<128x128xf32, #tpu.memory_space<vmem>>, %arg2: memref<1x128xi32, #tpu.memory_space<vmem>>, %arg3: memref<128x128xf32, #tpu.memory_space<vmem>>, %arg4: memref<128x128xf32, #tpu.memory_space<vmem>>, %arg5: memref<1x128xf32, #tpu.memory_space<vmem>>) attributes {dimension_semantics = [#tpu.dimension_semantics<parallel>], iteration_bounds = array<i64: 1>, scalar_prefetch = 0 : i64, scratch_operands = 0 : i64, tpu.core_type = #tpu.core_type<tc>, window_params = [{pipeline_mode = #tpu.pipeline_mode<synchronous>, transform_indices = @transform_0, window_bounds = array<i64: 128, 128>}, {transform_indices = @transform_1, window_bounds = array<i64: 1, 128>}, {transform_indices = @transform_2, window_bounds = array<i64: 128, 128>}, {transform_indices = @transform_3, window_bounds = array<i64: 128, 128>}, {transform_indices = @transform_4, window_bounds = array<i64: 1, 128>}]} {
    %c0 = arith.constant 0 : index
    %c0_0 = arith.constant 0 : index
    %0 = vector.load %arg3[%c0, %c0_0] : memref<128x128xf32, #tpu.memory_space<vmem>>, vector<128x128xf32>
    %c0_1 = arith.constant 0 : index
    %c0_2 = arith.constant 0 : index
    %1 = vector.load %arg4[%c0_1, %c0_2] : memref<128x128xf32, #tpu.memory_space<vmem>>, vector<128x128xf32>
    %c0_3 = arith.constant 0 : index
    %c0_4 = arith.constant 0 : index
    %2 = vector.load %arg2[%c0_3, %c0_4] : memref<1x128xi32, #tpu.memory_space<vmem>>, vector<1x128xi32>
    %3 = tpu.iota {dimensions = array<i32: 0>} : vector<128x128xi32>
    %4 = vector.broadcast %2 : vector<1x128xi32> to vector<128x128xi32>
    %5 = arith.cmpi slt, %3, %4 : vector<128x128xi32>
    %cst = arith.constant 5.000000e-01 : f32
    %6 = vector.broadcast %cst : f32 to vector<128x128xf32>
    %7 = arith.mulf %6, %1 : vector<128x128xf32>
    %8 = arith.addf %0, %7 : vector<128x128xf32>
    %cst_5 = arith.constant 0.000000e+00 : f32
    %9 = vector.broadcast %cst_5 : f32 to vector<128x128xf32>
    %10 = arith.subf %9, %0 : vector<128x128xf32>
    %cst_6 = arith.constant 5.000000e-01 : f32
    %11 = vector.broadcast %cst_6 : f32 to vector<128x128xf32>
    %12 = arith.mulf %11, %1 : vector<128x128xf32>
    %13 = arith.addf %10, %12 : vector<128x128xf32>
    %cst_7 = arith.constant -1.000000e+30 : f32
    %14 = vector.broadcast %cst_7 : f32 to vector<128x128xf32>
    %15 = arith.select %5, %8, %14 : vector<128x128xi1>, vector<128x128xf32>
    %cst_8 = arith.constant dense<0xFF800000> : vector<128xf32>
    %16 = vector.multi_reduction <maximumf>, %15, %cst_8 [0] : vector<128x128xf32> to vector<128xf32>
    %17 = vector.shape_cast %16 : vector<128xf32> to vector<1x128xf32>
    %18 = vector.broadcast %17 : vector<1x128xf32> to vector<128x128xf32>
    %19 = arith.subf %8, %18 : vector<128x128xf32>
    %cst_9 = arith.constant -1.000000e+30 : f32
    %20 = vector.broadcast %cst_9 : f32 to vector<128x128xf32>
    %21 = arith.select %5, %19, %20 : vector<128x128xi1>, vector<128x128xf32>
    %22 = math.exp %21 : vector<128x128xf32>
    %c0_10 = arith.constant 0 : index
    %c0_11 = arith.constant 0 : index
    %23 = vector.load %arg1[%c0_10, %c0_11] : memref<128x128xf32, #tpu.memory_space<vmem>>, vector<128x128xf32>
    %cst_12 = arith.constant dense<0.000000e+00> : vector<128x128xf32>
    %24 = tpu.matmul %23, %22, %cst_12 {dimension_numbers = #tpu.dot_dimension_numbers<[1], [0], [0], [1], [0, 0, 1, 1], [], []>} : vector<128x128xf32>, vector<128x128xf32>, vector<128x128xf32> -> vector<128x128xf32>
    %cst_13 = arith.constant 1.000000e+00 : f32
    %25 = vector.broadcast %cst_13 : f32 to vector<128x128xf32>
    %26 = arith.select %5, %24, %25 : vector<128x128xi1>, vector<128x128xf32>
    %27 = vector.broadcast %17 : vector<1x128xf32> to vector<128x128xf32>
    %28 = arith.addf %13, %27 : vector<128x128xf32>
    %29 = math.log %26 : vector<128x128xf32>
    %30 = arith.addf %28, %29 : vector<128x128xf32>
    %cst_14 = arith.constant 0.000000e+00 : f32
    %31 = vector.broadcast %cst_14 : f32 to vector<128x128xf32>
    %32 = arith.select %5, %30, %31 : vector<128x128xi1>, vector<128x128xf32>
    %33 = arith.sitofp %2 : vector<1x128xi32> to vector<1x128xf32>
    %cst_15 = arith.constant 1.000000e+00 : f32
    %34 = vector.broadcast %cst_15 : f32 to vector<1x128xf32>
    %35 = arith.maximumf %33, %34 : vector<1x128xf32>
    %36 = tpu.reciprocal %35 {approx = true} : vector<1x128xf32> -> vector<1x128xf32>
    %cst_16 = arith.constant dense<0.000000e+00> : vector<128xf32>
    %37 = vector.multi_reduction <add>, %32, %cst_16 [0] : vector<128x128xf32> to vector<128xf32>
    %38 = vector.shape_cast %37 : vector<128xf32> to vector<1x128xf32>
    %39 = arith.mulf %38, %36 : vector<1x128xf32>
    %c0_17 = arith.constant 0 : index
    %c0_18 = arith.constant 0 : index
    %40 = vector.load %arg5[%c0_17, %c0_18] : memref<1x128xf32, #tpu.memory_space<vmem>>, vector<1x128xf32>
    tpu.vector_store %arg5[%c0_17, %c0_18], %39 {strides = array<i32>} : memref<1x128xf32, #tpu.memory_space<vmem>>, vector<1x128xf32>,
    return
  }
  func.func @transform_0(%arg0: i32) -> (i32, i32) {
    %c0_i32 = arith.constant 0 : i32
    %c0_i32_0 = arith.constant 0 : i32
    %c0_i32_1 = arith.constant 0 : i32
    return %c0_i32, %c0_i32_0 : i32, i32
  }
  func.func @transform_1(%arg0: i32) -> (i32, i32) {
    %c0_i32 = arith.constant 0 : i32
    %c0_i32_0 = arith.constant 0 : i32
    return %c0_i32, %arg0 : i32, i32
  }
  func.func @transform_2(%arg0: i32) -> (i32, i32) {
    %c0_i32 = arith.constant 0 : i32
    %c0_i32_0 = arith.constant 0 : i32
    return %c0_i32, %arg0 : i32, i32
  }
  func.func @transform_3(%arg0: i32) -> (i32, i32) {
    %c0_i32 = arith.constant 0 : i32
    %c0_i32_0 = arith.constant 0 : i32
    return %c0_i32, %arg0 : i32, i32
  }
  func.func @transform_4(%arg0: i32) -> (i32, i32) {
    %c0_i32 = arith.constant 0 : i32
    %c0_i32_0 = arith.constant 0 : i32
    return %c0_i32, %arg0 : i32, i32
  }
}

</mosaic_0001>

<bundles_post_ra>
// kernel: tpu_custom_call.1
= control target key start
LH: loop header
LB: loop body
LE: loop exit
PB: predicated region body
PF: predicated region fallthrough
CT: control target
= control target key end

     0   :  { %9 = vsyncpa [#allocation3], 0  ;;  %s1406_s0 = inlined_call_operand.hbm [shape: f32[128,128], index: 0, kind: input, shape index: {}]   ;;  %s1407_s1 = inlined_call_operand.vmem [shape: s32[1,128], index: 1, kind: input, shape index: {}]   ;;  %s1408_s2 = inlined_call_operand.hbm [shape: f32[128,128], index: 2, kind: input, shape index: {}]   ;;  %s1409_s3 = inlined_call_operand.hbm [shape: f32[128,128], index: 3, kind: input, shape index: {}]   ;;  %s1410_s4 = inlined_call_operand.hbm [shape: f32[1,128], index: 4, kind: output, shape index: {}]  }
   0x1   :  { %10 = vsyncpa [#allocation6], 0 }
   0x2   :  { %11 = vsyncpa [#allocation4], 0  ;;  %s871_s15 = smov [#allocation5]   ;;  %s872_s17 = smov [#allocation2]  }
   0x3   :  { %s31_s16 = sshll.u32 %s871_s15, 4  ;;  %s17_s18 = sshll.u32 %s872_s17, 4  ;;  %s32_s16 = int_to_ptr.vmem [resolvable:$true] %s31_s16  ;;  %s18_s18 = int_to_ptr.vmem [resolvable:$true] %s17_s18 }
   0x4   :  { %s793_s19 = scalar_lea.vmem %s32_s16, 2048  ;;  %p798_p1 = scmp.lt.s32.totalorder %s32_s16, %s32_s16 }
   0x5   :  { %p794_p0 = scmp.ne.s32.totalorder %s32_s16, %s793_s19  ;;  %p799_p2 = scmp.lt.s32.totalorder %s793_s19, %s793_s19 }
   0x7   :  { %p800_p3 = por %p799_p2, %p798_p1 }
   0x9   :  { %p801_p4 = pnand %p800_p3, %p794_p0 }
   0xb   :  { %804 = shalt.err (!%p801_p4)
}
   0xc   :  { %s873_s20 = smov 128   ;;  %s874_s21 = smov 8  }
   0xd   :  { %37 = dma.hbm_to_vmem [thread:$0]  %s1408_s2, 2048, %s32_s16, [#allocation6], %s873_s20, %s873_s20, %s874_s21  }
   0xe   :  { %s813_s24 = scalar_lea.vmem %s18_s18, 2048  ;;  %p818_p6 = scmp.lt.s32.totalorder %s18_s18, %s18_s18 }
   0xf   :  { %p814_p5 = scmp.ne.s32.totalorder %s18_s18, %s813_s24  ;;  %p819_p7 = scmp.lt.s32.totalorder %s813_s24, %s813_s24 }
  0x11   :  { %p820_p8 = por %p819_p7, %p818_p6 }
  0x13   :  { %p821_p9 = pnand %p820_p8, %p814_p5 }
  0x15   :  { %824 = shalt.err (!%p821_p9)
}
  0x16   :  { %23 = dma.hbm_to_vmem [thread:$0]  %s1406_s0, 2048, %s18_s18, [#allocation3], %s873_s20, %s873_s20, %s874_s21  }
  0x17   :  { %s875_s27 = smov [#allocation7]  }
  0x18   :  { %s43_s28 = sshll.u32 %s875_s27, 4  ;;  %s44_s28 = int_to_ptr.vmem [resolvable:$true] %s43_s28 }
  0x19   :  { %s833_s29 = scalar_lea.vmem %s44_s28, 2048  ;;  %p838_p11 = scmp.lt.s32.totalorder %s44_s28, %s44_s28 }
  0x1a   :  { %p834_p10 = scmp.ne.s32.totalorder %s44_s28, %s833_s29  ;;  %p839_p12 = scmp.lt.s32.totalorder %s833_s29, %s833_s29 }
  0x1c   :  { %p840_p13 = por %p839_p12, %p838_p11 }
  0x1e   :  { %p841_p0 = pnand %p840_p13, %p834_p10 }
  0x20   :  { %844 = shalt.err (!%p841_p0)
}
  0x21   :  { %49 = dma.hbm_to_vmem [thread:$0]  %s1409_s3, 2048, %s44_s28, [#allocation6], %s873_s20, %s873_s20, %s874_s21  }
  0x22   :  { %865 = dma.done.wait [#allocation3], 2048  }
  0x23   :  { %866 = vsyncadd [#allocation3], 4294965248 }
  0x24   :  { %867 = dma.done.wait [#allocation6], 4096  }
  0x25   :  { %868 = vsyncadd [#allocation6], 4294963200  ;;  %v92_v0 = vlaneseq  ;;  %v937_v10 = vld [vmem:[#allocation5 + $0x8] sm:$0xff]  ;;  %v951_v15 = vld [vmem:[#allocation5] sm:$0xff] }
  0x26   :  { %v75_v16 = vld [vmem:[#allocation7] sm:$0xff]  ;;  %v76_v17 = vld [vmem:[#allocation7 + $0x8] sm:$0xff]  ;;  %v963_v22 = vld [vmem:[#allocation5 + $0x10] sm:$0xff] }
  0x27   :  { %v911_v1 = vshrl.u32 %v92_v0, 7  ;;  %1440 = vst [vmem:[#allocation12_spill] sm:$0xff] %v963_v22  ;;  %v965_v23 = vld [vmem:[#allocation5 + $0x18] sm:$0xff]  ;;  %v77_v24 = vld [vmem:[#allocation7 + $0x10] sm:$0xff]  ;;  %v79_v26 = vld [vmem:[#allocation7 + $0x20] sm:$0xff]  ;;  %v967_v27 = vmul.f32 0.5, %v75_v16 }
  0x28   :  { %v78_v25 = vld [vmem:[#allocation7 + $0x18] sm:$0xff]  ;;  %v969_v28 = vmul.f32 0.5, %v76_v17  ;;  %v972_v30 = vld [vmem:[#allocation5 + $0x20] sm:$0xff]  ;;  %v974_v31 = vld [vmem:[#allocation5 + $0x28] sm:$0xff]  ;;  %v976_v35 = vmul.f32 0.5, %v77_v24  ;;  %v980_v37 = vmul.f32 0.5, %v79_v26 }
  0x29   :  { %v914_v2 = vadd.s32 8, %v911_v1  ;;  %v917_v3 = vadd.s32 16, %v911_v1  ;;  %v920_v4 = vadd.s32 24, %v911_v1  ;;  %v923_v5 = vadd.s32 32, %v911_v1  ;;  %1441 = vst [vmem:[#allocation13_spill] sm:$0xff] %v967_v27  ;;  %1442 = vst [vmem:[#allocation14_spill] sm:$0xff] %v972_v30 }
  0x2a   :  { %v926_v6 = vadd.s32 40, %v911_v1  ;;  %v929_v7 = vadd.s32 48, %v911_v1  ;;  %v932_v8 = vadd.s32 56, %v911_v1  ;;  %v935_v9 = vadd.s32 64, %v911_v1  ;;  %1443 = vst [vmem:[#allocation15_spill] sm:$0xff] %v974_v31  ;;  %v80_v32 = vld [vmem:[#allocation7 + $0x28] sm:$0xff] }
  0x2b   :  { %v940_v11 = vadd.s32 72, %v911_v1  ;;  %v943_v12 = vadd.s32 80, %v911_v1  ;;  %v946_v13 = vadd.s32 88, %v911_v1  ;;  %v949_v14 = vadd.s32 96, %v911_v1  ;;  %v81_v33 = vld [vmem:[#allocation7 + $0x30] sm:$0xff]  ;;  %v82_v34 = vld [vmem:[#allocation7 + $0x38] sm:$0xff] }
  0x2c   :  { %v954_v18 = vadd.s32 104, %v911_v1  ;;  %v957_v19 = vadd.s32 112, %v911_v1  ;;  %v960_v20 = vadd.s32 120, %v911_v1  ;;  %v111_v21 = vsub.s32 0, %v911_v1  ;;  %1444 = vst [vmem:[#allocation16_spill] sm:$0xff] %v976_v35  ;;  %1446 = vst [vmem:[#allocation18_spill] sm:$0xff] %v980_v37 }
  0x2d   :  { %v978_v36 = vmul.f32 0.5, %v78_v25  ;;  %v982_v38 = vld [vmem:[#allocation5 + $0x30] sm:$0xff]  ;;  %v984_v39 = vld [vmem:[#allocation5 + $0x38] sm:$0xff]  ;;  %v83_v40 = vld [vmem:[#allocation7 + $0x40] sm:$0xff]  ;;  %v986_v43 = vmul.f32 0.5, %v80_v32  ;;  %v988_v44 = vmul.f32 0.5, %v81_v33  ;;  %v1009_v57 = vadd.f32 %v967_v27, %v951_v15 }
  0x2e   :  { %1447 = vst [vmem:[#allocation19_spill] sm:$0xff] %v982_v38  ;;  %1448 = vst [vmem:[#allocation20_spill] sm:$0xff] %v984_v39  ;;  %v84_v41 = vld [vmem:[#allocation7 + $0x48] sm:$0xff]  ;;  %v85_v42 = vld [vmem:[#allocation7 + $0x50] sm:$0xff]  ;;  %v990_v45 = vmul.f32 0.5, %v82_v34  ;;  %v992_v49 = vmul.f32 0.5, %v83_v40  ;;  %v1013_v58 = vadd.f32 %v969_v28, %v937_v10  ;;  %v1022_v61 = vadd.f32 %v976_v35, %v963_v22 }
  0x2f   :  { %1445 = vst [vmem:[#allocation17_spill] sm:$0xff] %v978_v36  ;;  %1449 = vst [vmem:[#allocation21_spill] sm:$0xff] %v986_v43  ;;  %v86_v46 = vld [vmem:[#allocation7 + $0x58] sm:$0xff]  ;;  %v87_v47 = vld [vmem:[#allocation7 + $0x60] sm:$0xff]  ;;  %v994_v50 = vmul.f32 0.5, %v84_v41  ;;  %v996_v51 = vmul.f32 0.5, %v85_v42  ;;  %v1026_v62 = vadd.f32 %v978_v36, %v965_v23  ;;  %v1034_v17 = vadd.f32 %v980_v37, %v972_v30 }
  0x30   :  { %1450 = vst [vmem:[#allocation22_spill] sm:$0xff] %v988_v44  ;;  %1451 = vst [vmem:[#allocation23_spill] sm:$0xff] %v990_v45  ;;  %v88_v48 = vld [vmem:[#allocation7 + $0x68] sm:$0xff]  ;;  %v89_v52 = vld [vmem:[#allocation7 + $0x70] sm:$0xff]  ;;  %v1003_v55 = vmul.f32 0.5, %v86_v46  ;;  %v1005_v56 = vmul.f32 0.5, %v87_v47  ;;  %v1048_v25 = vadd.f32 %v988_v44, %v982_v38  ;;  %v1052_v26 = vadd.f32 %v990_v45, %v984_v39 }
  0x31   :  { %1452 = vst [vmem:[#allocation24_spill] sm:$0xff] %v992_v49  ;;  %1453 = vst [vmem:[#allocation25_spill] sm:$0xff] %v994_v50  ;;  %v90_v53 = vld [vmem:[#allocation7 + $0x78] sm:$0xff]  ;;  %v1001_v54 = vld [vmem:[%s1407_s1] sm:$0x1]  ;;  %v1018_v60 = vmul.f32 0.5, %v88_v48 }
  0x32   :  { %1454 = vst [vmem:[#allocation26_spill] sm:$0xff] %v996_v51  ;;  %1455 = vst [vmem:[#allocation27_spill] sm:$0xff] %v1001_v54  ;;  %v1016_v59 = vrot.slane %v1001_v54, %v111_v21  ;;  %v294_v63 = vld [vmem:[#allocation2] sm:$0xff]  ;;  %v1028_v0 = vmul.f32 0.5, %v89_v52  ;;  %v1030_v16 = vmul.f32 0.5, %v90_v53  ;;  %v1038_v21 = vadd.f32 %v986_v43, %v974_v31  ;;  %v1054_v33 = vld [vmem:[#allocation5 + $0x48] sm:$0xff] }
  0x33   :  { %1456 = vst [vmem:[#allocation28_spill] sm:$0xff] %v1003_v55  ;;  %1457 = vst [vmem:[#allocation29_spill] sm:$0xff] %v1005_v56  ;;  %657 = vmatprep.mubr.f32.mxu0 %v294_v63  ;;  %v1040_v24 = vld [vmem:[#allocation5 + $0x40] sm:$0xff]  ;;  %v1056_v34 = vld [vmem:[#allocation5 + $0x50] sm:$0xff]  ;;  %v1100_v52 = vadd.f32 %v994_v50, %v1054_v33  ;;  %s876_s1 = smov [#allocation8]  }
  0x34   :  { %1458 = vst [vmem:[#allocation30_spill] sm:$0xff] %v1018_v60  ;;  %1459 = vst [vmem:[#allocation31_spill] sm:$0xff] %v1028_v0  ;;  %vm113_vm0 = vcmp.lt.s32.totalorder %v911_v1, %v1016_v59  ;;  %vm114_vm1 = vcmp.lt.s32.totalorder %v914_v2, %v1016_v59  ;;  %v302_v32 = vld [vmem:[#allocation2 + $0x40] sm:$0xff]  ;;  %v1058_v40 = vld [vmem:[#allocation5 + $0x58] sm:$0xff]  ;;  %vm115_vm2 = vcmp.lt.s32.totalorder %v917_v3, %v1016_v59  ;;  %s583_s5 = sshll.u32 %s876_s1, 4  ;;  %s584_s5 = int_to_ptr.vmem [resolvable:$true] %s583_s5 }
  0x35   :  { %1460 = vst [vmem:[#allocation32_spill] sm:$0xff] %v1030_v16  ;;  %1461 = vst [vmem:[#allocation33_spill] sm:$0xff] %v1040_v24  ;;  %vm116_vm3 = vcmp.lt.s32.totalorder %v920_v4, %v1016_v59  ;;  %vm117_vm4 = vcmp.lt.s32.totalorder %v923_v5, %v1016_v59  ;;  %vm118_vm5 = vcmp.lt.s32.totalorder %v926_v6, %v1016_v59  ;;  %669 = vmatprep.mubr.f32.mxu1 %v302_v32  ;;  %v1068_v41 = vld [vmem:[#allocation5 + $0x60] sm:$0xff]  ;;  %v1070_v42 = vld [vmem:[#allocation5 + $0x68] sm:$0xff]  ;;  %s845_s6 = scalar_lea.vmem %s584_s5, 16  ;;  %s849_s7 = scalar_lea.vmem %s584_s5, 32 }
  0x36   :  { %1462 = vst [vmem:[#allocation34_spill] sm:$0xff] %v1054_v33  ;;  %1463 = vst [vmem:[#allocation35_spill] sm:$0xff] %v1056_v34  ;;  %v1072_v46 = vld [vmem:[#allocation5 + $0x70] sm:$0xff]  ;;  %vm119_vm6 = vcmp.lt.s32.totalorder %v929_v7, %v1016_v59  ;;  %vm120_vm7 = vcmp.lt.s32.totalorder %v932_v8, %v1016_v59  ;;  %vm121_vm8 = vcmp.lt.s32.totalorder %v935_v9, %v1016_v59  ;;  %v1090_v47 = vld [vmem:[#allocation5 + $0x78] sm:$0xff]  ;;  %v193_v50 = vsel %vm113_vm0, %v1009_v57, -1e+30  ;;  %p846_p1 = scmp.ne.s32.totalorder %s584_s5, %s845_s6  ;;  %p850_p2 = scmp.lt.s32.totalorder %s584_s5, %s584_s5 }
  0x37   :  { %1464 = vst [vmem:[#allocation36_spill] sm:$0xff] %v1058_v40  ;;  %1465 = vst [vmem:[#allocation37_spill] sm:$0xff] %v1068_v41  ;;  %vm122_vm9 = vcmp.lt.s32.totalorder %v940_v11, %v1016_v59  ;;  %vm123_vm10 = vcmp.lt.s32.totalorder %v943_v12, %v1016_v59  ;;  %vm124_vm11 = vcmp.lt.s32.totalorder %v946_v13, %v1016_v59  ;;  %p851_p3 = scmp.lt.s32.totalorder %s849_s7, %s845_s6 }
  0x38   :  { %1466 = vst [vmem:[#allocation38_spill] sm:$0xff] %v1070_v42  ;;  %1467 = vst [vmem:[#allocation39_spill] sm:$0xff] %v1072_v46  ;;  %vm125_vm12 = vcmp.lt.s32.totalorder %v949_v14, %v1016_v59  ;;  %vm126_vm13 = vcmp.lt.s32.totalorder %v954_v18, %v1016_v59  ;;  %vm127_vm14 = vcmp.lt.s32.totalorder %v957_v19, %v1016_v59 }
  0x39   :  { %1468 = vst [vmem:[#allocation40_spill] sm:$0xff] %v1090_v47  ;;  %v1096_v48 = vadd.f32 %v992_v49, %v1040_v24  ;;  %v1104_v53 = vadd.f32 %v996_v51, %v1056_v34  ;;  %v156_v63 = vadd.f32 %v1003_v55, %v1058_v40  ;;  %v157_v32 = vadd.f32 %v1005_v56, %v1068_v41  ;;  %p852_p4 = por %p851_p3, %p850_p2 }
  0x3a   :  { %v158_v29 = vadd.f32 %v1018_v60, %v1070_v42  ;;  %v159_v54 = vadd.f32 %v1028_v0, %v1072_v46  ;;  %v194_v51 = vsel %vm114_vm1, %v1013_v58, -1e+30  ;;  %v195_v56 = vsel %vm115_vm2, %v1022_v61, -1e+30 }
  0x3b   :  { %v1469_v60 = vsub.f32 0.0, %v937_v10  ;;  %v160_v0 = vadd.f32 %v1030_v16, %v1090_v47  ;;  %v196_v46 = vsel %vm116_vm3, %v1026_v62, -1e+30  ;;  %v197_v55 = vsel %vm117_vm4, %v1034_v17, -1e+30  ;;  %p853_p5 = pnand %p852_p4, %p846_p1 }
  0x3c   :  { %v198_v10 = vsel %vm118_vm5, %v1038_v21, -1e+30  ;;  %v201_v16 = vsel %vm121_vm8, %v1096_v48, -1e+30  ;;  %v209_v47 = vmax.f32 %v193_v50, %v197_v55  ;;  %vm128_vm15 = vcmp.lt.s32.totalorder %v960_v20, %v1016_v59 }
  0x3d   :  { %v1129_v42 = vadd.f32 %v1469_v60, %v969_v28  ;;  %v199_v28 = vsel %vm119_vm6, %v1048_v25, -1e+30  ;;  %v200_v60 = vsel %vm120_vm7, %v1052_v26, -1e+30  ;;  %v202_v41 = vsel %vm122_vm9, %v1100_v52, -1e+30 }
  0x3e   :  { %v203_v40 = vsel %vm123_vm10, %v1104_v53, -1e+30  ;;  %v210_v49 = vmax.f32 %v194_v51, %v198_v10  ;;  %v204_v34 = vsel %vm124_vm11, %v156_v63, -1e+30  ;;  %v205_v50 = vsel %vm125_vm12, %v157_v32, -1e+30 }
  0x3f   :  { %1470 = vst [vmem:[#allocation41_spill] sm:$0xff] %v1129_v42  ;;  %v206_v55 = vsel %vm126_vm13, %v158_v29, -1e+30  ;;  %v211_v33 = vmax.f32 %v195_v56, %v199_v28  ;;  %v207_v24 = vsel %vm127_vm14, %v159_v54, -1e+30  ;;  %v212_v44 = vmax.f32 %v196_v46, %v200_v60 }
  0x40   :  { %v213_v45 = vmax.f32 %v209_v47, %v201_v16  ;;  %v214_v51 = vmax.f32 %v210_v49, %v202_v41  ;;  %v208_v10 = vsel %vm128_vm15, %v160_v0, -1e+30 }
  0x41   :  { %v215_v38 = vmax.f32 %v211_v33, %v203_v40  ;;  %v216_v39 = vmax.f32 %v212_v44, %v204_v34 }
  0x42   :  { %v217_v37 = vmax.f32 %v213_v45, %v205_v50  ;;  %v218_v43 = vmax.f32 %v214_v51, %v206_v55 }
  0x43   :  { %v219_v35 = vmax.f32 %v215_v38, %v207_v24  ;;  %v220_v36 = vmax.f32 %v216_v39, %v208_v10 }
  0x44   :  { %v221_v42 = vmax.f32 %v217_v37, %v218_v43 }
  0x45   :  { %v222_v30 = vmax.f32 %v219_v35, %v220_v36 }
  0x47   :  { %v223_v56 = vmax.f32 %v221_v42, %v222_v30 }
  0x49   :  { %v224_v28 = vrot.slane %v223_v56, 4 }
  0x4b   :  { %v225_v31 = vmax.f32 %v223_v56, %v224_v28 }
  0x4d   :  { %v226_v27 = vrot.slane %v225_v31, 2 }
  0x4f   :  { %v227_v22 = vmax.f32 %v225_v31, %v226_v27 }
  0x51   :  { %v228_v46 = vrot.slane %v227_v22, 1 }
  0x53   :  { %v1182_v16 = vmax.f32 %v227_v22, %v228_v46 }
  0x55   :  { %v245_v49 = vsub.f32 %v160_v0, %v1182_v16  ;;  %v244_v41 = vsub.f32 %v159_v54, %v1182_v16  ;;  %v243_v44 = vsub.f32 %v158_v29, %v1182_v16  ;;  %v242_v45 = vsub.f32 %v157_v32, %v1182_v16 }
  0x56   :  { %v241_v38 = vsub.f32 %v156_v63, %v1182_v16  ;;  %v240_v31 = vsub.f32 %v1104_v53, %v1182_v16  ;;  %v239_v43 = vsub.f32 %v1100_v52, %v1182_v16  ;;  %v238_v24 = vsub.f32 %v1096_v48, %v1182_v16 }
  0x57   :  { %v261_v30 = vsel %vm128_vm15, %v245_v49, -1e+30  ;;  %v260_v27 = vsel %vm127_vm14, %v244_v41, -1e+30  ;;  %v259_v22 = vsel %vm126_vm13, %v243_v44, -1e+30  ;;  %v237_v40 = vsub.f32 %v1052_v26, %v1182_v16 }
  0x58   :  { %v292_v29 = vmul.f32 1.442695, %v261_v30  ;;  %v290_v35 = vmul.f32 1.442695, %v260_v27  ;;  %v288_v36 = vmul.f32 1.442695, %v259_v22  ;;  %v236_v52 = vsub.f32 %v1048_v25, %v1182_v16 }
  0x59   :  { %v258_v37 = vsel %vm125_vm12, %v242_v45, -1e+30  ;;  %v257_v39 = vsel %vm124_vm11, %v241_v38, -1e+30  ;;  %v256_v0 = vsel %vm123_vm10, %v240_v31, -1e+30  ;;  %v235_v63 = vsub.f32 %v1038_v21, %v1182_v16 }
  0x5a   :  { %719 = vpow2.f32 %v292_v29  ;;  %v286_v54 = vmul.f32 1.442695, %v258_v37  ;;  %v284_v33 = vmul.f32 1.442695, %v257_v39  ;;  %v255_v34 = vsel %vm122_vm9, %v239_v43, -1e+30 }
  0x5b   :  { %721 = vpow2.f32 %v290_v35  ;;  %v282_v42 = vmul.f32 1.442695, %v256_v0  ;;  %v254_v47 = vsel %vm121_vm8, %v238_v24, -1e+30  ;;  %v280_v48 = vmul.f32 1.442695, %v255_v34 }
  0x5c   :  { %723 = vpow2.f32 %v288_v36  ;;  %v253_v53 = vsel %vm120_vm7, %v237_v40, -1e+30  ;;  %v278_v26 = vmul.f32 1.442695, %v254_v47  ;;  %v252_v32 = vsel %vm119_vm6, %v236_v52, -1e+30 }
  0x5d   :  { %725 = vpow2.f32 %v286_v54  ;;  %v234_v60 = vsub.f32 %v1034_v17, %v1182_v16  ;;  %v276_v25 = vmul.f32 1.442695, %v253_v53  ;;  %v251_v50 = vsel %vm118_vm5, %v235_v63, -1e+30  ;;  %v295_v40 = vld [vmem:[#allocation2 + $0x8] sm:$0xff]  ;;  %v296_v47 = vld [vmem:[#allocation2 + $0x10] sm:$0xff] }
  0x5e   :  { %727 = vpow2.f32 %v284_v33  ;;  %v233_v55 = vsub.f32 %v1026_v62, %v1182_v16  ;;  %v274_v21 = vmul.f32 1.442695, %v252_v32  ;;  %v232_v56 = vsub.f32 %v1022_v61, %v1182_v16  ;;  %v304_v52 = vld [vmem:[#allocation2 + $0x50] sm:$0xff]  ;;  %v305_v53 = vld [vmem:[#allocation2 + $0x58] sm:$0xff]  ;;  %v298_v63 = vld [vmem:[#allocation2 + $0x20] sm:$0xff] }
  0x5f   :  { %729 = vpow2.f32 %v282_v42  ;;  %v250_v10 = vsel %vm117_vm4, %v234_v60, -1e+30  ;;  %v272_v28 = vmul.f32 1.442695, %v251_v50  ;;  %v231_v49 = vsub.f32 %v1013_v58, %v1182_v16  ;;  %v303_v42 = vld [vmem:[#allocation2 + $0x48] sm:$0xff]  ;;  %v308_v50 = vld [vmem:[#allocation2 + $0x70] sm:$0xff] }
  0x60   :  { %731 = vpow2.f32 %v280_v48  ;;  %v249_v62 = vsel %vm116_vm3, %v233_v55, -1e+30  ;;  %v270_v41 = vmul.f32 1.442695, %v250_v10  ;;  %v248_v44 = vsel %vm115_vm2, %v232_v56, -1e+30 }
  0x61   :  { %733 = vpow2.f32 %v278_v26  ;;  %v230_v45 = vsub.f32 %v1009_v57, %v1182_v16  ;;  %v268_v38 = vmul.f32 1.442695, %v249_v62  ;;  %v247_v58 = vsel %vm114_vm1, %v231_v49, -1e+30  ;;  %v297_v48 = vld [vmem:[#allocation2 + $0x18] sm:$0xff]  ;;  %v306_v26 = vld [vmem:[#allocation2 + $0x60] sm:$0xff] }
  0x62   :  { %735 = vpow2.f32 %v276_v25  ;;  %v266_v27 = vmul.f32 1.442695, %v248_v44  ;;  %v264_v31 = vmul.f32 1.442695, %v247_v58  ;;  %v299_v32 = vld [vmem:[#allocation2 + $0x28] sm:$0xff]  ;;  %v300_v25 = vld [vmem:[#allocation2 + $0x30] sm:$0xff] }
  0x63   :  { %737 = vpow2.f32 %v274_v21  ;;  %v246_v57 = vsel %vm113_vm0, %v230_v45, -1e+30  ;;  %v307_v60 = vld [vmem:[#allocation2 + $0x68] sm:$0xff]  ;;  %v301_v55 = vld [vmem:[#allocation2 + $0x38] sm:$0xff] }
  0x64   :  { %739 = vpow2.f32 %v272_v28  ;;  %v262_v35 = vmul.f32 1.442695, %v246_v57  ;;  %v309_v21 = vld [vmem:[#allocation2 + $0x78] sm:$0xff] }
  0x65   :  { %741 = vpow2.f32 %v270_v41 }
  0x66   :  { %743 = vpow2.f32 %v268_v38  ;;  %v161_v38 = vsub.f32 0.0, %v951_v15 }
  0x67   :  { %v720_v51 = vpop.eup %719  ;;  %745 = vpow2.f32 %v266_v27 }
  0x68   :  { %v722_v17 = vpop.eup %721  ;;  %625 = vmatprep.subr.mxu0 %v720_v51  ;;  %681 = vmatprep.subr.mxu1 %v720_v51  ;;  %747 = vpow2.f32 %v264_v31 }
  0x69   :  { %v724_v46 = vpop.eup %723  ;;  %626 = vmatpush3.msra.mxu0 %v720_v51  ;;  %697 = vmatpush3.msra.mxu1 %v720_v51  ;;  %749 = vpow2.f32 %v262_v35 }
  0x6a   :  { %627 = vmatprep.subr.mxu0 %v722_v17  ;;  %682 = vmatprep.subr.mxu1 %v722_v17  ;;  %v726_v61 = vpop.eup %725 }
  0x6b   :  { %628 = vmatpush3.msra.mxu0 %v722_v17  ;;  %698 = vmatpush3.msra.mxu1 %v722_v17  ;;  %v728_v30 = vpop.eup %727 }
  0x6c   :  { %629 = vmatprep.subr.mxu0 %v724_v46  ;;  %683 = vmatprep.subr.mxu1 %v724_v46  ;;  %v730_v22 = vpop.eup %729 }
  0x6d   :  { %630 = vmatpush3.msra.mxu0 %v724_v46  ;;  %699 = vmatpush3.msra.mxu1 %v724_v46  ;;  %v732_v29 = vpop.eup %731 }
  0x6e   :  { %631 = vmatprep.subr.mxu0 %v726_v61  ;;  %684 = vmatprep.subr.mxu1 %v726_v61  ;;  %v734_v36 = vpop.eup %733 }
  0x6f   :  { %632 = vmatpush3.msra.mxu0 %v726_v61  ;;  %700 = vmatpush3.msra.mxu1 %v726_v61  ;;  %v736_v37 = vpop.eup %735 }
  0x70   :  { %633 = vmatprep.subr.mxu0 %v728_v30  ;;  %685 = vmatprep.subr.mxu1 %v728_v30  ;;  %v738_v39 = vpop.eup %737 }
  0x71   :  { %634 = vmatpush3.msra.mxu0 %v728_v30  ;;  %701 = vmatpush3.msra.mxu1 %v728_v30  ;;  %v740_v43 = vpop.eup %739 }
  0x72   :  { %635 = vmatprep.subr.mxu0 %v730_v22  ;;  %686 = vmatprep.subr.mxu1 %v730_v22  ;;  %v742_v54 = vpop.eup %741 }
  0x73   :  { %636 = vmatpush3.msra.mxu0 %v730_v22  ;;  %702 = vmatpush3.msra.mxu1 %v730_v22  ;;  %v744_v0 = vpop.eup %743  ;;  %v164_v22 = vsub.f32 0.0, %v965_v23 }
  0x74   :  { %637 = vmatprep.subr.mxu0 %v732_v29  ;;  %687 = vmatprep.subr.mxu1 %v732_v29  ;;  %v746_v24 = vpop.eup %745 }
  0x75   :  { %638 = vmatpush3.msra.mxu0 %v732_v29  ;;  %703 = vmatpush3.msra.mxu1 %v732_v29  ;;  %v748_v33 = vpop.eup %747  ;;  %v1471_v29 = vld [vmem:[#allocation12_spill] sm:$0xff] }
  0x76   :  { %639 = vmatprep.subr.mxu0 %v734_v36  ;;  %688 = vmatprep.subr.mxu1 %v734_v36  ;;  %v750_v34 = vpop.eup %749  ;;  %v163_v35 = vsub.f32 0.0, %v1471_v29 }
  0x77   :  { %640 = vmatpush3.msra.mxu0 %v734_v36  ;;  %704 = vmatpush3.msra.mxu1 %v734_v36  ;;  %v1472_v36 = vld [vmem:[#allocation13_spill] sm:$0xff] }
  0x78   :  { %641 = vmatprep.subr.mxu0 %v736_v37  ;;  %689 = vmatprep.subr.mxu1 %v736_v37 }
  0x79   :  { %642 = vmatpush3.msra.mxu0 %v736_v37  ;;  %705 = vmatpush3.msra.mxu1 %v736_v37  ;;  %v177_v37 = vadd.f32 %v161_v38, %v1472_v36 }
  0x7a   :  { %643 = vmatprep.subr.mxu0 %v738_v39  ;;  %690 = vmatprep.subr.mxu1 %v738_v39 }
  0x7b   :  { %644 = vmatpush3.msra.mxu0 %v738_v39  ;;  %706 = vmatpush3.msra.mxu1 %v738_v39 }
  0x7c   :  { %645 = vmatprep.subr.mxu0 %v740_v43  ;;  %691 = vmatprep.subr.mxu1 %v740_v43 }
  0x7d   :  { %646 = vmatpush3.msra.mxu0 %v740_v43  ;;  %707 = vmatpush3.msra.mxu1 %v740_v43 }
  0x7e   :  { %647 = vmatprep.subr.mxu0 %v742_v54  ;;  %692 = vmatprep.subr.mxu1 %v742_v54 }
  0x7f   :  { %648 = vmatpush3.msra.mxu0 %v742_v54  ;;  %708 = vmatpush3.msra.mxu1 %v742_v54  ;;  %v1473_v54 = vld [vmem:[#allocation15_spill] sm:$0xff] }
  0x80   :  { %649 = vmatprep.subr.mxu0 %v744_v0  ;;  %693 = vmatprep.subr.mxu1 %v744_v0 }
  0x81   :  { %650 = vmatpush3.msra.mxu0 %v744_v0  ;;  %709 = vmatpush3.msra.mxu1 %v744_v0  ;;  %v166_v0 = vsub.f32 0.0, %v1473_v54 }
  0x82   :  { %651 = vmatprep.subr.mxu0 %v746_v24  ;;  %694 = vmatprep.subr.mxu1 %v746_v24 }
  0x83   :  { %652 = vmatpush3.msra.mxu0 %v746_v24  ;;  %710 = vmatpush3.msra.mxu1 %v746_v24  ;;  %v1474_v24 = vld [vmem:[#allocation14_spill] sm:$0xff] }
  0x84   :  { %653 = vmatprep.subr.mxu0 %v748_v33  ;;  %695 = vmatprep.subr.mxu1 %v748_v33 }
  0x85   :  { %654 = vmatpush3.msra.mxu0 %v748_v33  ;;  %711 = vmatpush3.msra.mxu1 %v748_v33  ;;  %v165_v33 = vsub.f32 0.0, %v1474_v24  ;;  %v1484_v24 = vld [vmem:[#allocation33_spill] sm:$0xff] }
  0x86   :  { %655 = vmatprep.subr.mxu0 %v750_v34  ;;  %696 = vmatprep.subr.mxu1 %v750_v34 }
  0x87   :  { %656 = vmatpush3.msra.mxu0 %v750_v34  ;;  %712 = vmatpush3.msra.mxu1 %v750_v34 }
  0x88   :  { %658 = vmatmul.mubr.f32.vlgmr.msra.gmra.mxu0 %v295_v40  ;;  %670 = vmatmul.mubr.f32.vlgmr.msra.gmra.mxu1 %v303_v42  ;;  %v1475_v40 = vld [vmem:[#allocation41_spill] sm:$0xff] }
  0x89   :  { %660 = vmatprep.mubr.f32.mxu0 %v296_v47  ;;  %672 = vmatprep.mubr.f32.mxu1 %v304_v52  ;;  %v472_v42 = vadd.f32 %v1182_v16, %v1475_v40  ;;  %v1476_v47 = vld [vmem:[#allocation17_spill] sm:$0xff] }
  0x8a   :  { %v180_v52 = vadd.f32 %v164_v22, %v1476_v47 }
  0x8c   :  { %661 = vmatmul.mubr.f32.gmra.mxu0 %v297_v48  ;;  %673 = vmatmul.mubr.f32.gmra.mxu1 %v305_v53  ;;  %v474_v38 = vadd.f32 %v1182_v16, %v180_v52 }
  0x8d   :  { %663 = vmatprep.mubr.f32.mxu0 %v298_v63  ;;  %675 = vmatprep.mubr.f32.mxu1 %v306_v26  ;;  %v1477_v63 = vld [vmem:[#allocation16_spill] sm:$0xff] }
  0x8e   :  { %v179_v26 = vadd.f32 %v163_v35, %v1477_v63 }
  0x90   :  { %664 = vmatmul.mubr.f32.gmra.mxu0 %v299_v32  ;;  %676 = vmatmul.mubr.f32.gmra.mxu1 %v307_v60 }
  0x91   :  { %666 = vmatprep.mubr.f32.mxu0 %v300_v25  ;;  %678 = vmatprep.mubr.f32.mxu1 %v308_v50  ;;  %v471_v50 = vadd.f32 %v1182_v16, %v177_v37  ;;  %v1482_v37 = vld [vmem:[#allocation23_spill] sm:$0xff] }
  0x94   :  { %667 = vmatmul.mubr.f32.gmra.mxu0 %v301_v55  ;;  %679 = vmatmul.mubr.f32.gmra.mxu1 %v309_v21 }
 0x148   :  { %v659_v51 = vpop.f32.mrf.mxu0  ;;  %v671_v10 = vpop.f32.mrf.mxu1 }
 0x149   :  { %v456_v56 = vsel %vm114_vm1, %v659_v51, 1.0  ;;  %v464_v23 = vsel %vm122_vm9, %v671_v10, 1.0  ;;  %v1478_v10 = vld [vmem:[#allocation21_spill] sm:$0xff] }
 0x14a   :  { %751 = vlog2.f32 %v456_v56  ;;  %v376_v17 = vpop.f32.mrf.mxu0  ;;  %v416_v28 = vpop.f32.mrf.mxu1  ;;  %v182_v56 = vadd.f32 %v166_v0, %v1478_v10  ;;  %v1487_v10 = vld [vmem:[#allocation24_spill] sm:$0xff] }
 0x14b   :  { %v455_v46 = vsel %vm113_vm0, %v376_v17, 1.0  ;;  %v463_v31 = vsel %vm121_vm8, %v416_v28, 1.0  ;;  %v1479_v17 = vld [vmem:[#allocation18_spill] sm:$0xff] }
 0x14c   :  { %753 = vlog2.f32 %v455_v46  ;;  %v662_v62 = vpop.f32.mrf.mxu0  ;;  %v674_v49 = vpop.f32.mrf.mxu1  ;;  %v181_v28 = vadd.f32 %v165_v33, %v1479_v17  ;;  %v1480_v46 = vld [vmem:[#allocation20_spill] sm:$0xff]  ;;  %v169_v33 = vsub.f32 0.0, %v1484_v24 }
 0x14d   :  { %v458_v41 = vsel %vm116_vm3, %v662_v62, 1.0  ;;  %v466_v55 = vsel %vm124_vm11, %v674_v49, 1.0  ;;  %v168_v62 = vsub.f32 0.0, %v1480_v46 }
 0x14e   :  { %755 = vlog2.f32 %v458_v41  ;;  %v386_v61 = vpop.f32.mrf.mxu0  ;;  %v426_v44 = vpop.f32.mrf.mxu1  ;;  %v1481_v41 = vld [vmem:[#allocation19_spill] sm:$0xff]  ;;  %v475_v36 = vadd.f32 %v1182_v16, %v181_v28  ;;  %v185_v2 = vadd.f32 %v169_v33, %v1487_v10  ;;  %v1488_v28 = vld [vmem:[#allocation25_spill] sm:$0xff] }
 0x14f   :  { %v457_v45 = vsel %vm115_vm2, %v386_v61, 1.0  ;;  %v465_v60 = vsel %vm123_vm10, %v426_v44, 1.0  ;;  %v167_v61 = vsub.f32 0.0, %v1481_v41 }
 0x150   :  { %757 = vlog2.f32 %v457_v45  ;;  %v665_v30 = vpop.f32.mrf.mxu0  ;;  %v677_v58 = vpop.f32.mrf.mxu1 }
 0x151   :  { %v460_v27 = vsel %vm118_vm5, %v665_v30, 1.0  ;;  %v473_v30 = vadd.f32 %v1182_v16, %v179_v26 }
 0x152   :  { %759 = vlog2.f32 %v460_v27  ;;  %v396_v57 = vpop.f32.mrf.mxu0  ;;  %v436_v43 = vpop.f32.mrf.mxu1 }
 0x153   :  { %v459_v15 = vsel %vm117_vm4, %v396_v57, 1.0  ;;  %v467_v49 = vsel %vm125_vm12, %v436_v43, 1.0 }
 0x154   :  { %761 = vlog2.f32 %v459_v15  ;;  %v668_v39 = vpop.f32.mrf.mxu0  ;;  %v680_v21 = vpop.f32.mrf.mxu1  ;;  %v476_v15 = vadd.f32 %v1182_v16, %v182_v56 }
 0x155   :  { %v462_v34 = vsel %vm120_vm7, %v668_v39, 1.0  ;;  %763 = vlog2.f32 %v463_v31  ;;  %v468_v31 = vsel %vm126_vm13, %v677_v58, 1.0  ;;  %v184_v39 = vadd.f32 %v168_v62, %v1482_v37  ;;  %v1485_v58 = vld [vmem:[#allocation34_spill] sm:$0xff]  ;;  %v1489_v62 = vld [vmem:[#allocation36_spill] sm:$0xff] }
 0x156   :  { %765 = vlog2.f32 %v462_v34  ;;  %v406_v48 = vpop.f32.mrf.mxu0  ;;  %v446_v29 = vpop.f32.mrf.mxu1  ;;  %v170_v40 = vsub.f32 0.0, %v1485_v58  ;;  %v172_v41 = vsub.f32 0.0, %v1489_v62  ;;  %v479_v37 = vadd.f32 %v1182_v16, %v185_v2  ;;  %v1497_v2 = vld [vmem:[#allocation40_spill] sm:$0xff] }
 0x157   :  { %v752_v53 = vpop.eup %751  ;;  %v461_v32 = vsel %vm119_vm6, %v406_v48, 1.0  ;;  %767 = vlog2.f32 %v464_v23  ;;  %v1483_v23 = vld [vmem:[#allocation22_spill] sm:$0xff]  ;;  %v469_v47 = vsel %vm127_vm14, %v446_v29, 1.0  ;;  %v176_v7 = vsub.f32 0.0, %v1497_v2 }
 0x158   :  { %v490_v25 = vmul.f32 0.6931472, %v752_v53  ;;  %769 = vlog2.f32 %v461_v32  ;;  %v183_v54 = vadd.f32 %v167_v61, %v1483_v23  ;;  %v478_v32 = vadd.f32 %v1182_v16, %v184_v39 }
 0x159   :  { %v754_v51 = vpop.eup %753  ;;  %771 = vlog2.f32 %v465_v60  ;;  %v186_v46 = vadd.f32 %v170_v40, %v1488_v28 }
 0x15a   :  { %v488_v45 = vmul.f32 0.6931472, %v754_v51  ;;  %773 = vlog2.f32 %v466_v55  ;;  %v520_v27 = vadd.f32 %v490_v25, %v472_v42  ;;  %v470_v42 = vsel %vm128_vm15, %v680_v21, 1.0  ;;  %v1486_v25 = vld [vmem:[#allocation35_spill] sm:$0xff] }
 0x15b   :  { %v756_v44 = vpop.eup %755  ;;  %775 = vlog2.f32 %v467_v49  ;;  %v477_v60 = vadd.f32 %v1182_v16, %v183_v54 }
 0x15c   :  { %v519_v22 = vadd.f32 %v488_v45, %v471_v50  ;;  %v494_v57 = vmul.f32 0.6931472, %v756_v44  ;;  %777 = vlog2.f32 %v468_v31  ;;  %v536_v1 = vsel %vm114_vm1, %v520_v27, 0.0  ;;  %v1490_v27 = vld [vmem:[#allocation26_spill] sm:$0xff] }
 0x15d   :  { %v758_v35 = vpop.eup %757  ;;  %v171_v50 = vsub.f32 0.0, %v1486_v25  ;;  %779 = vlog2.f32 %v469_v47  ;;  %v1494_v47 = vld [vmem:[#allocation29_spill] sm:$0xff] }
 0x15e   :  { %v535_v43 = vsel %vm113_vm0, %v519_v22, 0.0  ;;  %v492_v0 = vmul.f32 0.6931472, %v758_v35  ;;  %v522_v52 = vadd.f32 %v494_v57, %v474_v38  ;;  %781 = vlog2.f32 %v470_v42  ;;  %v1491_v57 = vld [vmem:[#allocation37_spill] sm:$0xff] }
 0x15f   :  { %v760_v34 = vpop.eup %759  ;;  %v554_v26 = vadd.f32 %v536_v1, %v535_v43  ;;  %v187_v22 = vadd.f32 %v171_v50, %v1490_v27  ;;  %v173_v31 = vsub.f32 0.0, %v1491_v57  ;;  %v1493_v43 = vld [vmem:[#allocation38_spill] sm:$0xff]  ;;  %v1499_v27 = vld [vmem:[#allocation32_spill] sm:$0xff] }
 0x160   :  { %v521_v48 = vadd.f32 %v492_v0, %v473_v30  ;;  %v498_v53 = vmul.f32 0.6931472, %v760_v34  ;;  %v538_v45 = vsel %vm116_vm3, %v522_v52, 0.0  ;;  %v174_v0 = vsub.f32 0.0, %v1493_v43 }
 0x161   :  { %v762_v63 = vpop.eup %761  ;;  %v481_v42 = vadd.f32 %v1182_v16, %v187_v22  ;;  %v189_v1 = vadd.f32 %v173_v31, %v1494_v47  ;;  %v192_v22 = vadd.f32 %v176_v7, %v1499_v27 }
 0x162   :  { %v764_v55 = vpop.eup %763  ;;  %v537_v21 = vsel %vm115_vm2, %v521_v48, 0.0  ;;  %v496_v51 = vmul.f32 0.6931472, %v762_v63  ;;  %v524_v44 = vadd.f32 %v498_v53, %v476_v15  ;;  %v480_v15 = vadd.f32 %v1182_v16, %v186_v46  ;;  %v1495_v63 = vld [vmem:[#allocation39_spill] sm:$0xff] }
 0x163   :  { %v766_v56 = vpop.eup %765  ;;  %v555_v17 = vadd.f32 %v554_v26, %v537_v21  ;;  %v504_v39 = vmul.f32 0.6931472, %v764_v55  ;;  %v175_v26 = vsub.f32 0.0, %v1495_v63 }
 0x164   :  { %v768_v61 = vpop.eup %767  ;;  %v523_v38 = vadd.f32 %v496_v51, %v475_v36  ;;  %v502_v3 = vmul.f32 0.6931472, %v766_v56  ;;  %v1492_v36 = vld [vmem:[#allocation28_spill] sm:$0xff]  ;;  %v540_v33 = vsel %vm118_vm5, %v524_v44, 0.0 }
 0x165   :  { %v770_v30 = vpop.eup %769  ;;  %v556_v49 = vadd.f32 %v555_v17, %v538_v45  ;;  %v188_v54 = vadd.f32 %v172_v41, %v1492_v36  ;;  %v506_v58 = vmul.f32 0.6931472, %v768_v61  ;;  %v527_v48 = vadd.f32 %v504_v39, %v479_v37  ;;  %v1498_v41 = vld [vmem:[#allocation31_spill] sm:$0xff] }
 0x166   :  { %v539_v29 = vsel %vm117_vm4, %v523_v38, 0.0  ;;  %v500_v35 = vmul.f32 0.6931472, %v770_v30  ;;  %v772_v23 = vpop.eup %771  ;;  %v526_v34 = vadd.f32 %v502_v3, %v478_v32  ;;  %v1496_v32 = vld [vmem:[#allocation30_spill] sm:$0xff]  ;;  %v483_v17 = vadd.f32 %v1182_v16, %v189_v1  ;;  %v1500_v39 = vld [vmem:[#allocation27_spill] sm:$0xff] }
 0x167   :  { %v557_v4 = vadd.f32 %v556_v49, %v539_v29  ;;  %v774_v24 = vpop.eup %773  ;;  %v508_v53 = vmul.f32 0.6931472, %v772_v23  ;;  %v482_v6 = vadd.f32 %v1182_v16, %v188_v54  ;;  %v528_v51 = vadd.f32 %v506_v58, %v480_v15 }
 0x168   :  { %v525_v5 = vadd.f32 %v500_v35, %v477_v60  ;;  %v776_v25 = vpop.eup %775  ;;  %v190_v60 = vadd.f32 %v174_v0, %v1496_v32  ;;  %v542_v21 = vsel %vm120_vm7, %v526_v34, 0.0  ;;  %v510_v10 = vmul.f32 0.6931472, %v774_v24 }
 0x169   :  { %v558_v40 = vadd.f32 %v557_v4, %v540_v33  ;;  %v778_v55 = vpop.eup %777  ;;  %v543_v28 = vsel %vm121_vm8, %v527_v48, 0.0  ;;  %v529_v46 = vadd.f32 %v508_v53, %v481_v42  ;;  %v512_v62 = vmul.f32 0.6931472, %v776_v25 }
 0x16a   :  { %v541_v52 = vsel %vm119_vm6, %v525_v5, 0.0  ;;  %v191_v61 = vadd.f32 %v175_v26, %v1498_v41  ;;  %v780_v45 = vpop.eup %779  ;;  %v484_v8 = vadd.f32 %v1182_v16, %v190_v60  ;;  %v544_v3 = vsel %vm122_vm9, %v528_v51, 0.0 }
 0x16b   :  { %v559_v50 = vadd.f32 %v558_v40, %v541_v52  ;;  %v782_v38 = vpop.eup %781  ;;  %v530_v30 = vadd.f32 %v510_v10, %v482_v6  ;;  %v514_v49 = vmul.f32 0.6931472, %v778_v55  ;;  %v545_v9 = vsel %vm123_vm10, %v529_v46, 0.0 }
 0x16c   :  { %v531_v31 = vadd.f32 %v512_v62, %v483_v17  ;;  %v485_v29 = vadd.f32 %v1182_v16, %v191_v61  ;;  %v516_v35 = vmul.f32 0.6931472, %v780_v45  ;;  %v551_v23 = vcvt.s32.f32 %v1500_v39 }
 0x16d   :  { %v560_v56 = vadd.f32 %v559_v50, %v542_v21  ;;  %v546_v11 = vsel %vm124_vm11, %v530_v30, 0.0  ;;  %v532_v4 = vadd.f32 %v514_v49, %v484_v8  ;;  %v486_v15 = vadd.f32 %v1182_v16, %v192_v22 }
 0x16e   :  { %v518_v36 = vmul.f32 0.6931472, %v782_v38  ;;  %v547_v12 = vsel %vm125_vm12, %v531_v31, 0.0  ;;  %v533_v43 = vadd.f32 %v516_v35, %v485_v29  ;;  %v552_v24 = vmax.f32 %v551_v23, 1.0 }
 0x16f   :  { %v561_v44 = vadd.f32 %v560_v56, %v543_v28  ;;  %v548_v33 = vsel %vm126_vm13, %v532_v4, 0.0 }
 0x170   :  { %v534_v34 = vadd.f32 %v518_v36, %v486_v15  ;;  %v549_v13 = vsel %vm127_vm14, %v533_v43, 0.0  ;;  %783 = vrcp.f32 %v552_v24 }
 0x171   :  { %v562_v57 = vadd.f32 %v561_v44, %v544_v3 }
 0x172   :  { %v550_v14 = vsel %vm128_vm15, %v534_v34, 0.0 }
 0x173   :  { %v563_v37 = vadd.f32 %v562_v57, %v545_v9 }
 0x175   :  { %v564_v54 = vadd.f32 %v563_v37, %v546_v11 }
 0x177   :  { %v565_v0 = vadd.f32 %v564_v54, %v547_v12 }
 0x179   :  { %v566_v5 = vadd.f32 %v565_v0, %v548_v33 }
 0x17b   :  { %v567_v16 = vadd.f32 %v566_v5, %v549_v13 }
 0x17d   :  { %v568_v58 = vadd.f32 %v567_v16, %v550_v14  ;;  %v784_v18 = vpop.eup %783 }
 0x17f   :  { %v569_v40 = vrot.slane %v568_v58, 4 }
 0x181   :  { %v570_v42 = vadd.f32 %v569_v40, %v568_v58 }
 0x183   :  { %v571_v47 = vrot.slane %v570_v42, 2 }
 0x185   :  { %v572_v1 = vadd.f32 %v571_v47, %v570_v42 }
 0x187   :  { %v573_v52 = vrot.slane %v572_v1, 1 }
 0x189   :  { %v574_v48 = vadd.f32 %v573_v52, %v572_v1 }
 0x18b   :  { %v575_v53 = vmul.f32 %v784_v18, %v574_v48 }
 0x18d   :  { %576 = vst [vmem:[#allocation8] sm:$0x1] %v575_v53 }
 0x18e   :  { %856 = shalt.err (!%p853_p5)
}
 0x18f   :  { %586 = dma.vmem_to_hbm [thread:$0]  %s584_s5, 16, %s1410_s4, [#allocation4]  }
 0x190   :  { %869 = dma.done.wait [#allocation4], 16  }
 0x191   :  { %870 = vsyncadd [#allocation4], 4294967280 }
 0x192   :  { %590 = vsyncpa [#allocation3], 1 }
 0x193   :  { %591 = vsyncpa [#allocation6], 1 }
 0x194   :  { %592 = vsyncpa [#allocation4], 1 }

</bundles_post_ra>
